<compile_context>
chip_gen: v6e
topology: v6e:2x2x1
jax: 0.10.0
libtpu: 0.0.40
codegen_flags: <defaults>
</compile_context>

<pallas_src>
import jax
import jax.numpy as jnp
from jax import lax
from jax.experimental import pallas as pl
from jax.experimental.pallas import tpu as pltpu


# --------------------------------------------------------------------------
# helpers
# --------------------------------------------------------------------------
def _ru(a, b):
    return (a + b - 1) // b * b


def _pick_tile(dim_padded, cap, quantum):
    """Largest multiple of `quantum` that divides `dim_padded` and is <= cap."""
    cap = max(min(cap, dim_padded), quantum)
    t = (cap // quantum) * quantum
    while t > quantum:
        if dim_padded % t == 0:
            return t
        t -= quantum
    return quantum


def _vmem_info():
    """(tile-buffer budget bytes, physical VMEM bytes) for this TPU generation."""
    try:
        phys = int(getattr(pltpu.get_tpu_info(), "vmem_capacity_bytes"))
    except Exception:  # unknown backend -> conservative (v7x-sized) default
        phys = 64 << 20
    if phys <= (64 << 20):          # v7x-class: 64 MiB per TensorCore
        return 24 << 20, phys
    return 48 << 20, phys           # v5e / v6e: 128 MiB


def _footprint(tm, tn, tk, in_isz, out_isz, has_bias, use_scratch):
    # double-buffered input/output blocks + single-buffered f32 accumulator
    b = 2 * (tm * tk + tn * tk) * in_isz + 2 * tm * tn * out_isz
    if has_bias:
        b += 2 * tn * 4
    if use_scratch:
        b += tm * tn * 4
    return b


# --------------------------------------------------------------------------
# kernels
# --------------------------------------------------------------------------
def _dot_xt(x_ref, w_ref):
    # x tile (tm, tk) contracted with w tile (tn, tk) over K -> (tm, tn) f32.
    # Weight kept in PyTorch (out, in) layout: native transposed-RHS MXU matmul.
    return lax.dot_general(
        x_ref[...], w_ref[...],
        dimension_numbers=(((1,), (1,)), ((), ())),
        preferred_element_type=jnp.float32,
    )


# whole-K (2-D grid): single matmul per output tile, no reduction loop.
def _k_wholek_bias(x_ref, w_ref, b_ref, o_ref):
    o_ref[...] = (_dot_xt(x_ref, w_ref) + b_ref[...]).astype(o_ref.dtype)


def _k_wholek_nobias(x_ref, w_ref, o_ref):
    o_ref[...] = _dot_xt(x_ref, w_ref).astype(o_ref.dtype)


# K-tiled, f32 output: accumulate directly into the resident output block.
def _k_ktiled_f32_bias(x_ref, w_ref, b_ref, o_ref):
    k = pl.program_id(2)

    @pl.when(k == 0)
    def _():
        o_ref[...] = jnp.broadcast_to(b_ref[...], o_ref.shape)

    o_ref[...] += _dot_xt(x_ref, w_ref)


def _k_ktiled_f32_nobias(x_ref, w_ref, o_ref):
    k = pl.program_id(2)

    @pl.when(k == 0)
    def _():
        o_ref[...] = jnp.zeros_like(o_ref)

    o_ref[...] += _dot_xt(x_ref, w_ref)


# K-tiled, non-f32 output: f32 scratch accumulator, bias folded into init.
def _k_ktiled_acc_bias(x_ref, w_ref, b_ref, o_ref, acc_ref):
    k = pl.program_id(2)

    @pl.when(k == 0)
    def _():
        acc_ref[...] = jnp.broadcast_to(b_ref[...], acc_ref.shape)

    acc_ref[...] += _dot_xt(x_ref, w_ref)

    @pl.when(k == pl.num_programs(2) - 1)
    def _():
        o_ref[...] = acc_ref[...].astype(o_ref.dtype)


def _k_ktiled_acc_nobias(x_ref, w_ref, o_ref, acc_ref):
    k = pl.program_id(2)

    @pl.when(k == 0)
    def _():
        acc_ref[...] = jnp.zeros_like(acc_ref)

    acc_ref[...] += _dot_xt(x_ref, w_ref)

    @pl.when(k == pl.num_programs(2) - 1)
    def _():
        o_ref[...] = acc_ref[...].astype(o_ref.dtype)


# --------------------------------------------------------------------------
# padded-core driver
# --------------------------------------------------------------------------
def _linear_padded(x_p, w_p, b_p=None, *, max_tile_m=512, max_tile_n=512,
                   max_tile_k=None):
    """x_p:(Mp,Kp), w_p:(Np,Kp) same dtype as x_p, b_p:(1,Np) f32 or None.
    Mp multiple of 8 (16 for bf16), Kp/Np multiples of 128.  Returns (Mp,Np)."""
    Mp, Kp = x_p.shape
    Np, Kp2 = w_p.shape
    assert Kp == Kp2
    out_dtype = x_p.dtype
    in_isz = jnp.dtype(x_p.dtype).itemsize
    out_isz = jnp.dtype(out_dtype).itemsize
    has_bias = b_p is not None
    sub = 16 if x_p.dtype == jnp.bfloat16 else 8

    budget, phys = _vmem_info()

    # --- adaptive tile selection (tiles always divide the padded dims) -----
    tm = _pick_tile(Mp, min(Mp, max_tile_m), sub)
    tn = _pick_tile(Np, min(Np, max_tile_n), 128)
    tk_cap = Kp if max_tile_k is None else max_tile_k
    tk = _pick_tile(Kp, min(Kp, tk_cap), 128)       # prefer whole-K

    needs_scratch = out_dtype != jnp.float32        # k-tiled accum needs f32 scratch

    def _fits(tm_, tn_, tk_):
        scr = needs_scratch and (tk_ != Kp)
        return _footprint(tm_, tn_, tk_, in_isz, out_isz, has_bias, scr) <= budget

    while not _fits(tm, tn, tk) and tk > 128:
        tk = _pick_tile(Kp, tk // 2, 128)
    while not _fits(tm, tn, tk) and tn > 128:
        tn = _pick_tile(Np, tn // 2, 128)
    while not _fits(tm, tn, tk) and tm > sub:
        tm = _pick_tile(Mp, max(tm // 2, sub), sub)

    # v7x megacore: guarantee >= 2 blocks on a "parallel" axis when possible.
    if Mp // tm == 1 and Np // tn == 1 and Np >= 256:
        tn = _pick_tile(Np, Np // 2, 128)

    whole_k = (tk == Kp)
    use_scratch = needs_scratch and not whole_k
    footprint = _footprint(tm, tn, tk, in_isz, out_isz, has_bias, use_scratch)
    vmem_limit = int(min(max(footprint + (8 << 20), 32 << 20), phys - (4 << 20)))

    cost = pl.CostEstimate(
        flops=2 * Mp * Np * Kp,
        transcendentals=0,
        bytes_accessed=(Mp * Kp + Np * Kp) * in_isz + Mp * Np * out_isz
        + (Np * 4 if has_bias else 0),
    )

    if whole_k:
        grid = (Mp // tm, Np // tn)
        dims = ("parallel", "parallel")
        in_specs = [pl.BlockSpec((tm, tk), lambda i, j: (i, 0)),
                    pl.BlockSpec((tn, tk), lambda i, j: (j, 0))]
        if has_bias:
            in_specs.append(pl.BlockSpec((1, tn), lambda i, j: (0, j)))
        out_spec = pl.BlockSpec((tm, tn), lambda i, j: (i, j))
        kernel = _k_wholek_bias if has_bias else _k_wholek_nobias
        scratch = []
    else:
        grid = (Mp // tm, Np // tn, Kp // tk)
        dims = ("parallel", "parallel", "arbitrary")
        in_specs = [pl.BlockSpec((tm, tk), lambda i, j, k: (i, k)),
                    pl.BlockSpec((tn, tk), lambda i, j, k: (j, k))]
        if has_bias:
            in_specs.append(pl.BlockSpec((1, tn), lambda i, j, k: (0, j)))
        out_spec = pl.BlockSpec((tm, tn), lambda i, j, k: (i, j))
        if use_scratch:
            kernel = _k_ktiled_acc_bias if has_bias else _k_ktiled_acc_nobias
            scratch = [pltpu.VMEM((tm, tn), jnp.float32)]
        else:
            kernel = _k_ktiled_f32_bias if has_bias else _k_ktiled_f32_nobias
            scratch = []

    args = (x_p, w_p, b_p) if has_bias else (x_p, w_p)

    return pl.pallas_call(
        kernel,
        out_shape=jax.ShapeDtypeStruct((Mp, Np), out_dtype),
        grid_spec=pltpu.PrefetchScalarGridSpec(
            num_scalar_prefetch=0,
            grid=grid,
            in_specs=in_specs,
            out_specs=out_spec,
            scratch_shapes=scratch,
        ),
        compiler_params=pltpu.CompilerParams(
            dimension_semantics=dims,
            vmem_limit_bytes=vmem_limit,
        ),
        cost_estimate=cost,
    )(*args)


# --------------------------------------------------------------------------
# public wrappers
# --------------------------------------------------------------------------
def feedback_linear_forward(x, weight, bias=None, **tile_kwargs):
    """output = x @ weight.T + bias (forward of FeedbackLinearLayer).

    x: (..., in_features); weight: (out_features, in_features);
    bias: (out_features,) or None."""
    *lead, K = x.shape
    N, K2 = weight.shape
    assert K == K2, "in_features mismatch"
    x2 = x.reshape(-1, K)
    M = x2.shape[0]

    weight = weight.astype(x2.dtype)            # keep the single-dtype MXU path
    sub = 16 if x2.dtype == jnp.bfloat16 else 8
    Mp, Kp, Np = _ru(M, sub), _ru(K, 128), _ru(N, 128)

    x_p = x2 if (Mp == M and Kp == K) else jnp.pad(x2, ((0, Mp - M), (0, Kp - K)))
    w_p = weight if (Np == N and Kp == K) else jnp.pad(weight, ((0, Np - N), (0, Kp - K)))
    b_p = None
    if bias is not None:
        b_row = bias.astype(jnp.float32).reshape(1, N)
        b_p = b_row if Np == N else jnp.pad(b_row, ((0, 0), (0, Np - N)))

    out = _linear_padded(x_p, w_p, b_p, **tile_kwargs)[:M, :N]
    return out.reshape(*lead, N)


class FeedbackLinearLayer:
    """Forward-only port of the PyTorch module.

    Weight and bias are pre-padded to lane/sublane alignment once at
    construction, so the per-call path is just (tiny x pad) + the Pallas kernel.
    The feedback matrix B is stored for parity but unused in forward."""

    def __init__(self, weight, bias=None, B=None):
        self.out_features, self.in_features = weight.shape
        Np, Kp = _ru(self.out_features, 128), _ru(self.in_features, 128)
        if (Np, Kp) == weight.shape:
            self.w_p = weight
        else:
            self.w_p = jnp.pad(weight, ((0, Np - self.out_features),
                                        (0, Kp - self.in_features)))
        self.b_p = None
        if bias is not None:
            b_row = bias.astype(jnp.float32).reshape(1, -1)
            self.b_p = b_row if Np == self.out_features else jnp.pad(
                b_row, ((0, 0), (0, Np - self.out_features)))
        self.B = B if B is not None else weight      # backward-only buffer

    def __call__(self, x, **tile_kwargs):
        *lead, K = x.shape
        assert K == self.in_features, "in_features mismatch"
        x2 = x.reshape(-1, K).astype(self.w_p.dtype)
        M = x2.shape[0]
        sub = 16 if x2.dtype == jnp.bfloat16 else 8
        Mp, Kp = _ru(M, sub), self.w_p.shape[1]
        x_p = x2 if (Mp == M and Kp == K) else jnp.pad(
            x2, ((0, Mp - M), (0, Kp - K)))
        out = _linear_padded(x_p, self.w_p, self.b_p, **tile_kwargs)
        out = out[:M, :self.out_features]
        return out.reshape(*lead, self.out_features)


# --------------------------------------------------------------------------
# self-test
# --------------------------------------------------------------------------
if __name__ == "__main__":
    key = jax.random.PRNGKey(0)
    kx, kw, kb, kB = jax.random.split(key, 4)

    # 1) Module-like small shapes, bias, whole-K 2-D grid path (prepadded layer).
    batch, in_features, out_features = 8, 32, 64
    x = jax.random.normal(kx, (batch, in_features), dtype=jnp.float32)
    w = jax.random.normal(kw, (out_features, in_features), dtype=jnp.float32) * 0.05
    b = jax.random.normal(kb, (out_features,), dtype=jnp.float32) * 0.1
    B = jax.random.normal(kB, (out_features, in_features), dtype=jnp.float32)

    layer = FeedbackLinearLayer(w, b, B=B)
    out = jax.block_until_ready(layer(x))
    ref = x @ w.T + b[None, :]
    assert out.shape == (batch, out_features)
    assert jnp.allclose(out, ref, atol=2e-3, rtol=2e-3), "mismatch (bias, whole-K)"

    # 2) No bias, forced K-tiling: 3-D grid, f32 direct accumulation into output.
    M2, K2, N2 = 16, 256, 128
    x2 = jax.random.normal(kx, (M2, K2), dtype=jnp.float32)
    w2 = jax.random.normal(kw, (N2, K2), dtype=jnp.float32) * 0.03
    out2 = jax.block_until_ready(feedback_linear_forward(x2, w2, None, max_tile_k=128))
    ref2 = x2 @ w2.T
    assert jnp.allclose(out2, ref2, atol=1e-2, rtol=1e-2), "mismatch (no bias, K-tiled)"

    # 3) bf16 inputs, forced K-tiling: 3-D grid with f32 scratch accumulator.
    x3 = x2.astype(jnp.bfloat16)
    w3 = w2.astype(jnp.bfloat16)
    b3 = jax.random.normal(kb, (N2,), dtype=jnp.float32) * 0.1
    out3 = jax.block_until_ready(feedback_linear_forward(x3, w3, b3, max_tile_k=128))
    ref3 = (x3.astype(jnp.float32) @ w3.astype(jnp.float32).T + b3[None, :])
    assert jnp.allclose(out3.astype(jnp.float32), ref3, atol=3e-2, rtol=3e-2), \
        "mismatch (bf16, K-tiled, scratch)"

    print("KERNEL_OK")
</pallas_src>

<mosaic_0001>
module attributes {stable_mosaic.version = 11 : i64} {
  func.func @_k_wholek_bias(%arg0: i32, %arg1: i32, %arg2: memref<8x128xf32, #tpu.memory_space<vmem>>, %arg3: memref<128x128xf32, #tpu.memory_space<vmem>>, %arg4: memref<1x128xf32, #tpu.memory_space<vmem>>, %arg5: memref<8x128xf32, #tpu.memory_space<vmem>>) attributes {dimension_semantics = [#tpu.dimension_semantics<parallel>, #tpu.dimension_semantics<parallel>], iteration_bounds = array<i64: 1, 1>, scalar_prefetch = 0 : i64, scratch_operands = 0 : i64, tpu.core_type = #tpu.core_type<tc>, window_params = [{transform_indices = @transform_0, window_bounds = array<i64: 8, 128>}, {transform_indices = @transform_1, window_bounds = array<i64: 128, 128>}, {transform_indices = @transform_2, window_bounds = array<i64: 1, 128>}, {transform_indices = @transform_3, window_bounds = array<i64: 8, 128>}]} {
    %c0 = arith.constant 0 : index
    %c0_0 = arith.constant 0 : index
    %0 = vector.load %arg2[%c0, %c0_0] : memref<8x128xf32, #tpu.memory_space<vmem>>, vector<8x128xf32>
    %c0_1 = arith.constant 0 : index
    %c0_2 = arith.constant 0 : index
    %1 = vector.load %arg3[%c0_1, %c0_2] : memref<128x128xf32, #tpu.memory_space<vmem>>, vector<128x128xf32>
    %cst = arith.constant dense<0.000000e+00> : vector<8x128xf32>
    %2 = tpu.matmul %0, %1, %cst {dimension_numbers = #tpu.dot_dimension_numbers<[1], [1], [0], [0], [0, 0, 1, 0], [], []>} : vector<8x128xf32>, vector<128x128xf32>, vector<8x128xf32> -> vector<8x128xf32>
    %c0_3 = arith.constant 0 : index
    %c0_4 = arith.constant 0 : index
    %3 = vector.load %arg4[%c0_3, %c0_4] : memref<1x128xf32, #tpu.memory_space<vmem>>, vector<1x128xf32>
    %4 = vector.broadcast %3 : vector<1x128xf32> to vector<8x128xf32>
    %5 = arith.addf %2, %4 : vector<8x128xf32>
    %c0_5 = arith.constant 0 : index
    %c0_6 = arith.constant 0 : index
    %6 = vector.load %arg5[%c0_5, %c0_6] : memref<8x128xf32, #tpu.memory_space<vmem>>, vector<8x128xf32>
    tpu.vector_store %arg5[%c0_5, %c0_6], %5 {strides = array<i32>} : memref<8x128xf32, #tpu.memory_space<vmem>>, vector<8x128xf32>,
    return
  }
  func.func @transform_0(%arg0: i32, %arg1: i32) -> (i32, i32) {
    %c0_i32 = arith.constant 0 : i32
    %c0_i32_0 = arith.constant 0 : i32
    return %arg0, %c0_i32 : i32, i32
  }
  func.func @transform_1(%arg0: i32, %arg1: i32) -> (i32, i32) {
    %c0_i32 = arith.constant 0 : i32
    %c0_i32_0 = arith.constant 0 : i32
    return %arg1, %c0_i32 : i32, i32
  }
  func.func @transform_2(%arg0: i32, %arg1: i32) -> (i32, i32) {
    %c0_i32 = arith.constant 0 : i32
    %c0_i32_0 = arith.constant 0 : i32
    return %c0_i32, %arg1 : i32, i32
  }
  func.func @transform_3(%arg0: i32, %arg1: i32) -> (i32, i32) {
    %c0_i32 = arith.constant 0 : i32
    return %arg0, %arg1 : i32, i32
  }
}

</mosaic_0001>

<bundles_post_ra>
// kernel: tpu_custom_call.1
= control target key start
LH: loop header
LB: loop body
LE: loop exit
PB: predicated region body
PF: predicated region fallthrough
CT: control target
= control target key end

     0   :  { %8 = vsyncpa [#allocation3], 0  ;;  %s317_s0 = inlined_call_operand.hbm [shape: f32[8,128], index: 0, kind: input, shape index: {}]   ;;  %s318_s1 = inlined_call_operand.hbm [shape: f32[128,128], index: 1, kind: input, shape index: {}]   ;;  %s319_s2 = inlined_call_operand.vmem [shape: f32[1,128], index: 2, kind: input, shape index: {}]   ;;  %s320_s3 = inlined_call_operand.hbm [shape: f32[8,128], index: 3, kind: output, shape index: {}]  }
   0x1   :  { %9 = vsyncpa [#allocation6], 0 }
   0x2   :  { %10 = vsyncpa [#allocation4], 0  ;;  %s278_s12 = smov [#allocation2]   ;;  %s279_s14 = smov [#allocation5]  }
   0x3   :  { %s17_s13 = sshll.u32 %s278_s12, 4  ;;  %s26_s15 = sshll.u32 %s279_s14, 4  ;;  %s18_s13 = int_to_ptr.vmem [resolvable:$true] %s17_s13  ;;  %s27_s15 = int_to_ptr.vmem [resolvable:$true] %s26_s15 }
   0x4   :  { %s220_s16 = scalar_lea.vmem %s18_s13, 128  ;;  %p225_p1 = scmp.lt.s32.totalorder %s18_s13, %s18_s13 }
   0x5   :  { %p221_p0 = scmp.ne.s32.totalorder %s18_s13, %s220_s16  ;;  %p226_p2 = scmp.lt.s32.totalorder %s220_s16, %s220_s16 }
   0x7   :  { %p227_p3 = por %p226_p2, %p225_p1 }
   0x9   :  { %p228_p4 = pnand %p227_p3, %p221_p0 }
   0xb   :  { %231 = shalt.err (!%p228_p4)
}
   0xc   :  { %20 = dma.hbm_to_vmem [thread:$0]  %s317_s0, 128, %s18_s13, [#allocation3]  }
   0xd   :  { %s240_s19 = scalar_lea.vmem %s27_s15, 2048  ;;  %p245_p6 = scmp.lt.s32.totalorder %s27_s15, %s27_s15 }
   0xe   :  { %p241_p5 = scmp.ne.s32.totalorder %s27_s15, %s240_s19  ;;  %p246_p7 = scmp.lt.s32.totalorder %s240_s19, %s240_s19 }
  0x10   :  { %p247_p8 = por %p246_p7, %p245_p6 }
  0x12   :  { %p248_p9 = pnand %p247_p8, %p241_p5 }
  0x14   :  { %251 = shalt.err (!%p248_p9)
}
  0x15   :  { %s280_s20 = smov 128   ;;  %s281_s21 = smov 8  }
  0x16   :  { %32 = dma.hbm_to_vmem [thread:$0]  %s318_s1, 2048, %s27_s15, [#allocation6], %s280_s20, %s280_s20, %s281_s21  }
  0x17   :  { %272 = dma.done.wait [#allocation3], 128  }
  0x18   :  { %273 = vsyncadd [#allocation3], 4294967168 }
  0x19   :  { %274 = dma.done.wait [#allocation6], 2048  }
  0x1a   :  { %275 = vsyncadd [#allocation6], 4294965248  ;;  %v282_v0 = vmov 0.0   ;;  %vm283_vm0 = vmmov 0   ;;  %v57_v1 = vld [vmem:[#allocation5 + $0x78] sm:$0xff]  ;;  %v56_v2 = vld [vmem:[#allocation5 + $0x70] sm:$0xff] }
  0x1b   :  { %170 = vmatprep.subr.mxu0 %v282_v0  ;;  %202 = vmatprep.mubr.msk.f32.mxu0 %vm283_vm0, %v282_v0  ;;  %v55_v3 = vld [vmem:[#allocation5 + $0x68] sm:$0xff]  ;;  %v54_v4 = vld [vmem:[#allocation5 + $0x60] sm:$0xff]  ;;  %v53_v5 = vld [vmem:[#allocation5 + $0x58] sm:$0xff]  ;;  %s284_s24 = smov [#allocation7]  }
  0x1c   :  { %171 = vmatpush3.xpose.msra.mxu0 %v57_v1  ;;  %v52_v6 = vld [vmem:[#allocation5 + $0x50] sm:$0xff]  ;;  %v51_v7 = vld [vmem:[#allocation5 + $0x48] sm:$0xff]  ;;  %v50_v8 = vld [vmem:[#allocation5 + $0x40] sm:$0xff]  ;;  %s142_s25 = sshll.u32 %s284_s24, 4  ;;  %s143_s25 = int_to_ptr.vmem [resolvable:$true] %s142_s25 }
  0x1d   :  { %172 = vmatprep.subr.mxu0 %v282_v0  ;;  %v49_v9 = vld [vmem:[#allocation5 + $0x38] sm:$0xff]  ;;  %v48_v10 = vld [vmem:[#allocation5 + $0x30] sm:$0xff]  ;;  %v47_v11 = vld [vmem:[#allocation5 + $0x28] sm:$0xff]  ;;  %s252_s26 = scalar_lea.vmem %s143_s25, 128  ;;  %p257_p11 = scmp.lt.s32.totalorder %s143_s25, %s143_s25 }
  0x1e   :  { %v46_v12 = vld [vmem:[#allocation5 + $0x20] sm:$0xff]  ;;  %v45_v13 = vld [vmem:[#allocation5 + $0x18] sm:$0xff]  ;;  %v44_v14 = vld [vmem:[#allocation5 + $0x10] sm:$0xff]  ;;  %p253_p10 = scmp.ne.s32.totalorder %s143_s25, %s252_s26  ;;  %p258_p12 = scmp.lt.s32.totalorder %s252_s26, %s252_s26 }
  0x1f   :  { %v43_v15 = vld [vmem:[#allocation5 + $0x8] sm:$0xff]  ;;  %v42_v16 = vld [vmem:[#allocation5] sm:$0xff]  ;;  %v41_v17 = vld [vmem:[#allocation2] sm:$0xff] }
  0x20   :  { %173 = vmatpush3.xpose.msra.mxu0 %v56_v2  ;;  %v152_v18 = vld [vmem:[%s319_s2] ss:$0 sm:$0xff]  ;;  %p259_p13 = por %p258_p12, %p257_p11 }
  0x21   :  { %174 = vmatprep.subr.mxu0 %v282_v0 }
  0x22   :  { %p260_p0 = pnand %p259_p13, %p253_p10 }
  0x24   :  { %175 = vmatpush3.xpose.msra.mxu0 %v55_v3 }
  0x25   :  { %176 = vmatprep.subr.mxu0 %v282_v0 }
  0x28   :  { %177 = vmatpush3.xpose.msra.mxu0 %v54_v4 }
  0x29   :  { %178 = vmatprep.subr.mxu0 %v282_v0 }
  0x2c   :  { %179 = vmatpush3.xpose.msra.mxu0 %v53_v5 }
  0x2d   :  { %180 = vmatprep.subr.mxu0 %v282_v0 }
  0x30   :  { %181 = vmatpush3.xpose.msra.mxu0 %v52_v6 }
  0x31   :  { %182 = vmatprep.subr.mxu0 %v282_v0 }
  0x34   :  { %183 = vmatpush3.xpose.msra.mxu0 %v51_v7 }
  0x35   :  { %184 = vmatprep.subr.mxu0 %v282_v0 }
  0x38   :  { %185 = vmatpush3.xpose.msra.mxu0 %v50_v8 }
  0x39   :  { %186 = vmatprep.subr.mxu0 %v282_v0 }
  0x3c   :  { %187 = vmatpush3.xpose.msra.mxu0 %v49_v9 }
  0x3d   :  { %188 = vmatprep.subr.mxu0 %v282_v0 }
  0x40   :  { %189 = vmatpush3.xpose.msra.mxu0 %v48_v10 }
  0x41   :  { %190 = vmatprep.subr.mxu0 %v282_v0 }
  0x44   :  { %191 = vmatpush3.xpose.msra.mxu0 %v47_v11 }
  0x45   :  { %192 = vmatprep.subr.mxu0 %v282_v0 }
  0x48   :  { %193 = vmatpush3.xpose.msra.mxu0 %v46_v12 }
  0x49   :  { %194 = vmatprep.subr.mxu0 %v282_v0 }
  0x4c   :  { %195 = vmatpush3.xpose.msra.mxu0 %v45_v13 }
  0x4d   :  { %196 = vmatprep.subr.mxu0 %v282_v0 }
  0x50   :  { %197 = vmatpush3.xpose.msra.mxu0 %v44_v14 }
  0x51   :  { %198 = vmatprep.subr.mxu0 %v282_v0 }
  0x54   :  { %199 = vmatpush3.xpose.msra.mxu0 %v43_v15 }
  0x55   :  { %200 = vmatprep.subr.mxu0 %v282_v0 }
  0x58   :  { %201 = vmatpush3.xpose.msra.mxu0 %v42_v16 }
  0x5b   :  { %203 = vmatmul.mubr.f32.vlgmr.msra.gmra.mxu0 %v41_v17 }
 0x11b   :  { %v131_v19 = vpop.f32.mrf.mxu0 }
 0x11c   :  { %v132_v20 = vadd.f32 %v152_v18, %v131_v19 }
 0x11d   :  { %v204_v21 = vpop.f32.mrf.mxu0 }
 0x11e   :  { %135 = vst [vmem:[#allocation7] sm:$0xff] %v132_v20 }
 0x11f   :  { %263 = shalt.err (!%p260_p0)
}
 0x120   :  { %145 = dma.vmem_to_hbm [thread:$0]  %s143_s25, 128, %s320_s3, [#allocation4]  }
 0x121   :  { %276 = dma.done.wait [#allocation4], 128  }
 0x122   :  { %277 = vsyncadd [#allocation4], 4294967168 }
 0x123   :  { %149 = vsyncpa [#allocation3], 1 }
 0x124   :  { %150 = vsyncpa [#allocation6], 1 }
 0x125   :  { %151 = vsyncpa [#allocation4], 1 }

</bundles_post_ra>
